<compile_context>
chip_gen: v5e
topology: v5e:2x2
jax: 0.10.0
libtpu: 0.0.40
codegen_flags: <defaults>
</compile_context>

<pallas_src>
import jax
import jax.numpy as jnp
from jax.experimental import pallas as pl
from jax.experimental.pallas import tpu as pltpu


def _round_up(x, m):
    return ((x + m - 1) // m) * m


def _vmem_capacity_bytes():
    """Physical VMEM per TensorCore; conservative fallback when unavailable."""
    try:
        return int(pltpu.get_tpu_info().vmem_capacity_bytes)
    except Exception:
        return 64 << 20  # v7x-sized fallback; safe on every generation


def _num_tensorcores():
    """Best-effort TensorCore count (v7x = 2); 1 if the field isn't exposed."""
    try:
        info = pltpu.get_tpu_info()
        for name in ("num_cores", "core_count", "num_tensorcores",
                     "tensorcores_per_chip"):
            n = getattr(info, name, None)
            if n:
                return int(n)
    except Exception:
        pass
    return 1


def _choose_batch_block(B, S, Din, Ftot, Dp):
    """Batch elements per grid step, budgeted against this generation's VMEM."""
    vmem = _vmem_capacity_bytes()
    # ~1/4 of physical VMEM for the per-step working set; the rest covers the
    # double-buffered x/out blocks, the resident fused weight and compiler
    # scratch.  v5e/v6e (128 MiB) -> 32 MiB, v7x (64 MiB) -> 16 MiB.
    budget = vmem // 4
    # Rough f32 bytes per batch element per step: x, fused q|k|v projection,
    # scores + exp, attention output.
    per_b = 4 * S * (2 * Din + 2 * Ftot + 2 * S + 2 * Dp)
    bb = max(1, min(B, budget // max(per_b, 1)))
    # Keep Bb*S (M dim of the fused projection matmul) a multiple of the MXU
    # row granularity (256 rows on v6e/v7x) when the batch is large enough.
    row_gran = max(1, 256 // max(S, 1))
    if B >= row_gran and bb >= row_gran:
        bb = (bb // row_gran) * row_gran
    # v7x only (2 TCs): split the batch over both cores, but only when each
    # half still carries at least one full MXU pass of rows.  On 1-TC chips
    # this branch is skipped (it would just add a serial grid step).
    if _num_tensorcores() >= 2 and bb >= B and B * S >= 2 * 256:
        bb = pl.cdiv(B, 2)
    return bb, vmem


def make_attention_kernel(scale, hp, dp, dout, sanitize=True):
    """hp: padded q/k segment width, dp: padded v segment width, dout: real width."""
    inv_scale = 1.0 / float(scale)
    f32 = jnp.float32
    hi = jax.lax.Precision.HIGHEST

    def kernel(x_ref, w_ref, b_ref, o_ref):
        Bb, S, Din = x_ref.shape

        # Single fused projection matmul for the whole batch block:
        # (Bb*S, Din) @ (Din, 2*hp + dp) -> one MXU RHS push / result drain.
        x2 = x_ref[...].reshape(Bb * S, Din)
        proj = jnp.dot(x2, w_ref[...], preferred_element_type=f32,
                       precision=hi) + b_ref[...]

        # Segment slices land on 128-lane boundaries (no XLU lane shuffle).
        # Padded columns carry zero weight + zero bias -> exactly zero, so they
        # contribute nothing to the contractions below.
        q = proj[:, 0 * hp:1 * hp].reshape(Bb, S, hp)
        k = proj[:, 1 * hp:2 * hp].reshape(Bb, S, hp)
        v = proj[:, 2 * hp:2 * hp + dp].reshape(Bb, S, dp)

        # Batched scores; contract the last dims directly (no explicit k.T).
        scores = jnp.einsum("bqd,bkd->bqk", q, k, preferred_element_type=f32,
                            precision=hi) * inv_scale

        if sanitize:
            # masked_fill_(isinf, 0); after the fill only NaN can be
            # non-finite, so the isfinite mask reduces to a single ~isnan.
            scores = jnp.where(jnp.isinf(scores), jnp.zeros_like(scores), scores)
            mask = jnp.logical_not(jnp.isnan(scores)).astype(f32)

        m = jnp.max(scores, axis=-1, keepdims=True)
        e = jnp.exp(scores - m)
        # Exact division: the approximate EUP reciprocal exceeded the accepted
        # error budget (it is what tripped the previous correctness check).
        att_w = e / jnp.sum(e, axis=-1, keepdims=True)
        if sanitize:
            att_w = att_w * mask
        # dropout: identity in eval mode.

        out = jnp.einsum("bqk,bkd->bqd", att_w, v, preferred_element_type=f32,
                         precision=hi)
        # Store only the real Dout columns: no padded HBM writeback and no
        # separate slice kernel; a narrow masked vst is cheaper than 4x output
        # write traffic + an extra XLA op at Dout=32.
        o_ref[...] = out[:, :, :dout]

    return kernel


def prepare_attention_params(wq, bq, wk, bk, wv, bv):
    """One-time parameter prep (hoisted out of the per-call path).

    Builds the fused [q | k | v] projection weight/bias; each segment is
    zero-padded to a 128-lane boundary so in-kernel slices are lane-aligned.
    """
    din, h = wq.shape
    dout = wv.shape[1]
    hp = _round_up(h, 128)
    dp = _round_up(dout, 128)

    def pad_w(w, n):
        return jnp.pad(w, ((0, 0), (0, n - w.shape[1])))

    def pad_b(b, n):
        return jnp.pad(b, (0, n - b.shape[0]))

    w_cat = jnp.concatenate([pad_w(wq, hp), pad_w(wk, hp), pad_w(wv, dp)], axis=1)
    b_cat = jnp.concatenate([pad_b(bq, hp), pad_b(bk, hp), pad_b(bv, dp)]).reshape(1, -1)
    return w_cat, b_cat, (h, hp, dout, dp)


def base_attention(x, w_cat, b_cat, dims, hidden_dim, sanitize=True):
    """x: (B, S, Din) f32.  w_cat/b_cat/dims come from prepare_attention_params."""
    B, S, Din = x.shape
    h, hp, dout, dp = dims
    ftot = w_cat.shape[1]  # 2*hp + dp
    scale = float(hidden_dim) ** 0.5

    Bb, vmem = _choose_batch_block(B, S, Din, ftot, dp)
    grid = (pl.cdiv(B, Bb),)
    # NOTE: when B % Bb != 0 the tail grid step computes on an undefined region
    # of the x block; those rows are masked on the output write, so results are
    # unaffected (any NaN/Inf produced there is discarded by design).

    # Generous but generation-safe scoped-VMEM limit so the larger batch block
    # is actually granted: 3/4 of physical (96 MiB on v5e/v6e, 48 MiB on v7x).
    vmem_limit = int(min(vmem * 3 // 4, 96 << 20))

    return pl.pallas_call(
        make_attention_kernel(scale, hp, dp, dout, sanitize=sanitize),
        out_shape=jax.ShapeDtypeStruct((B, S, dout), jnp.float32),
        grid_spec=pltpu.PrefetchScalarGridSpec(
            num_scalar_prefetch=0,
            grid=grid,
            in_specs=[
                pl.BlockSpec((Bb, S, Din), lambda b: (b, 0, 0)),   # x batch block
                pl.BlockSpec((Din, ftot), lambda b: (0, 0)),       # fused W (resident)
                pl.BlockSpec((1, ftot), lambda b: (0, 0)),         # fused bias
            ],
            out_specs=pl.BlockSpec((Bb, S, dout), lambda b: (b, 0, 0)),
        ),
        compiler_params=pltpu.CompilerParams(
            dimension_semantics=("parallel",),
            vmem_limit_bytes=vmem_limit,
        ),
    )(x, w_cat, b_cat)


def reference_attention(x, wq, bq, wk, bk, wv, bv, hidden_dim):
    """Pure-JAX reference for the PyTorch module (eval mode), full f32 precision."""
    scale = float(hidden_dim) ** 0.5
    hi = jax.lax.Precision.HIGHEST
    q = jnp.einsum("bsi,ih->bsh", x, wq, precision=hi) + bq
    k = jnp.einsum("bsi,ih->bsh", x, wk, precision=hi) + bk
    v = jnp.einsum("bsi,id->bsd", x, wv, precision=hi) + bv
    scores = jnp.einsum("bsh,bth->bst", q, k, precision=hi) / scale
    scores = jnp.where(jnp.isinf(scores), 0.0, scores)
    mask = jnp.isfinite(scores).astype(jnp.float32)
    w = jax.nn.softmax(scores, axis=-1) * mask
    return jnp.einsum("bst,btd->bsd", w, v, precision=hi)


if __name__ == "__main__":
    B, S = 2, 8
    in_dim, hidden_dim, out_dim = 32, 32, 32

    key = jax.random.PRNGKey(0)
    kx, kwq, kbq, kwk, kbk, kwv, kbv = jax.random.split(key, 7)

    x = jax.random.normal(kx, (B, S, in_dim), dtype=jnp.float32)

    # Deterministic parameter init (PyTorch nn.Linear shapes, stored transposed).
    lim = 1.0 / (in_dim ** 0.5)
    wq = jax.random.uniform(kwq, (in_dim, hidden_dim), jnp.float32, -lim, lim)
    bq = jax.random.uniform(kbq, (hidden_dim,), jnp.float32, -lim, lim)
    wk = jax.random.uniform(kwk, (in_dim, hidden_dim), jnp.float32, -lim, lim)
    bk = jax.random.uniform(kbk, (hidden_dim,), jnp.float32, -lim, lim)
    wv = jax.random.uniform(kwv, (in_dim, out_dim), jnp.float32, -lim, lim)
    bv = jax.random.uniform(kbv, (out_dim,), jnp.float32, -lim, lim)

    # One-time parameter prep (fused + padded weights), hoisted out of the call path.
    w_cat, b_cat, dims = prepare_attention_params(wq, bq, wk, bk, wv, bv)

    out = base_attention(x, w_cat, b_cat, dims, hidden_dim)
    out = jax.block_until_ready(out)

    ref = reference_attention(x, wq, bq, wk, bk, wv, bv, hidden_dim)
    assert out.shape == (B, S, out_dim)
    # f32 end-to-end (fp32 MXU contraction precision, exact softmax division)
    # against a HIGHEST-precision XLA reference.
    assert jnp.allclose(out, ref, atol=1e-4, rtol=1e-4), (
        "mismatch vs reference: max abs err "
        f"{float(jnp.max(jnp.abs(out - ref)))}")

    print("KERNEL_OK")
</pallas_src>

<mosaic_0001>
module attributes {stable_mosaic.version = 11 : i64} {
  func.func @kernel(%arg0: i32, %arg1: memref<2x8x32xf32, #tpu.memory_space<vmem>>, %arg2: memref<32x384xf32, #tpu.memory_space<vmem>>, %arg3: memref<1x384xf32, #tpu.memory_space<vmem>>, %arg4: memref<2x8x32xf32, #tpu.memory_space<vmem>>) attributes {dimension_semantics = [#tpu.dimension_semantics<parallel>], iteration_bounds = array<i64: 1>, scalar_prefetch = 0 : i64, scratch_operands = 0 : i64, tpu.core_type = #tpu.core_type<tc>, window_params = [{transform_indices = @transform_0, window_bounds = array<i64: 2, 8, 32>}, {pipeline_mode = #tpu.pipeline_mode<synchronous>, transform_indices = @transform_1, window_bounds = array<i64: 32, 384>}, {pipeline_mode = #tpu.pipeline_mode<synchronous>, transform_indices = @transform_2, window_bounds = array<i64: 1, 384>}, {transform_indices = @transform_3, window_bounds = array<i64: 2, 8, 32>}]} {
    %c0 = arith.constant 0 : index
    %c0_0 = arith.constant 0 : index
    %c0_1 = arith.constant 0 : index
    %0 = vector.load %arg1[%c0, %c0_0, %c0_1] : memref<2x8x32xf32, #tpu.memory_space<vmem>>, vector<2x8x32xf32>
    %1 = vector.shape_cast %0 : vector<2x8x32xf32> to vector<16x32xf32>
    %c0_2 = arith.constant 0 : index
    %c0_3 = arith.constant 0 : index
    %2 = vector.load %arg2[%c0_2, %c0_3] : memref<32x384xf32, #tpu.memory_space<vmem>>, vector<32x384xf32>
    %cst = arith.constant dense<0.000000e+00> : vector<16x384xf32>
    %3 = tpu.matmul %1, %2, %cst {dimension_numbers = #tpu.dot_dimension_numbers<[1], [0], [0], [1], [0, 0, 1, 1], [], []>, precision = #tpu.contract_precision<fp32>} : vector<16x32xf32>, vector<32x384xf32>, vector<16x384xf32> -> vector<16x384xf32>
    %c0_4 = arith.constant 0 : index
    %c0_5 = arith.constant 0 : index
    %4 = vector.load %arg3[%c0_4, %c0_5] : memref<1x384xf32, #tpu.memory_space<vmem>>, vector<1x384xf32>
    %5 = vector.broadcast %4 : vector<1x384xf32> to vector<16x384xf32>
    %6 = arith.addf %3, %5 : vector<16x384xf32>
    %7 = vector.extract_strided_slice %6 {offsets = [0, 0], sizes = [16, 128], strides = [1, 1]} : vector<16x384xf32> to vector<16x128xf32>
    %8 = vector.shape_cast %7 : vector<16x128xf32> to vector<2x8x128xf32>
    %9 = vector.extract_strided_slice %6 {offsets = [0, 128], sizes = [16, 128], strides = [1, 1]} : vector<16x384xf32> to vector<16x128xf32>
    %10 = vector.shape_cast %9 : vector<16x128xf32> to vector<2x8x128xf32>
    %11 = vector.extract_strided_slice %6 {offsets = [0, 256], sizes = [16, 128], strides = [1, 1]} : vector<16x384xf32> to vector<16x128xf32>
    %12 = vector.shape_cast %11 : vector<16x128xf32> to vector<2x8x128xf32>
    "tpu.trace_start"() <{level = 10 : i32, message = "bqd,bkd->bqk"}> : () -> ()
    %cst_6 = arith.constant dense<0.000000e+00> : vector<2x8x8xf32>
    %13 = tpu.matmul %8, %10, %cst_6 {dimension_numbers = #tpu.dot_dimension_numbers<[2], [2], [1], [1], [0, 0, 0, 1, 1, 1], [0], [0]>, precision = #tpu.contract_precision<fp32>} : vector<2x8x128xf32>, vector<2x8x128xf32>, vector<2x8x8xf32> -> vector<2x8x8xf32>
    "tpu.trace_stop"() : () -> ()
    %cst_7 = arith.constant 0.176776692 : f32
    %14 = vector.broadcast %cst_7 : f32 to vector<2x8x8xf32>
    %15 = arith.mulf %13, %14 : vector<2x8x8xf32>
    %16 = math.absf %15 : vector<2x8x8xf32>
    %cst_8 = arith.constant 0x7F800000 : f32
    %17 = vector.broadcast %cst_8 : f32 to vector<2x8x8xf32>
    %18 = arith.cmpf oeq, %16, %17 : vector<2x8x8xf32>
    %cst_9 = arith.constant 0.000000e+00 : f32
    %19 = vector.broadcast %cst_9 : f32 to vector<2x8x8xf32>
    %20 = arith.select %18, %19, %15 : vector<2x8x8xi1>, vector<2x8x8xf32>
    %21 = arith.cmpf one, %20, %20 : vector<2x8x8xf32>
    %cst_10 = arith.constant dense<true> : vector<2x8x8xi1>
    %22 = arith.xori %21, %cst_10 : vector<2x8x8xi1>
    %23 = arith.extui %22 : vector<2x8x8xi1> to vector<2x8x8xi32>
    %24 = arith.sitofp %23 : vector<2x8x8xi32> to vector<2x8x8xf32>
    %cst_11 = arith.constant dense<0xFF800000> : vector<2x8xf32>
    %25 = vector.multi_reduction <maximumf>, %20, %cst_11 [2] : vector<2x8x8xf32> to vector<2x8xf32>
    %26 = vector.shape_cast %25 : vector<2x8xf32> to vector<2x8x1xf32>
    %27 = vector.broadcast %26 : vector<2x8x1xf32> to vector<2x8x8xf32>
    %28 = arith.subf %20, %27 : vector<2x8x8xf32>
    %29 = math.exp %28 : vector<2x8x8xf32>
    %cst_12 = arith.constant dense<0.000000e+00> : vector<2x8xf32>
    %30 = vector.multi_reduction <add>, %29, %cst_12 [2] : vector<2x8x8xf32> to vector<2x8xf32>
    %31 = vector.shape_cast %30 : vector<2x8xf32> to vector<2x8x1xf32>
    %32 = vector.broadcast %31 : vector<2x8x1xf32> to vector<2x8x8xf32>
    %33 = arith.divf %29, %32 : vector<2x8x8xf32>
    %34 = arith.mulf %33, %24 : vector<2x8x8xf32>
    "tpu.trace_start"() <{level = 10 : i32, message = "bqk,bkd->bqd"}> : () -> ()
    %cst_13 = arith.constant dense<0.000000e+00> : vector<2x8x128xf32>
    %35 = tpu.matmul %34, %12, %cst_13 {dimension_numbers = #tpu.dot_dimension_numbers<[2], [1], [1], [2], [0, 0, 0, 1, 1, 2], [0], [0]>, precision = #tpu.contract_precision<fp32>} : vector<2x8x8xf32>, vector<2x8x128xf32>, vector<2x8x128xf32> -> vector<2x8x128xf32>
    "tpu.trace_stop"() : () -> ()
    %36 = vector.extract_strided_slice %35 {offsets = [0, 0, 0], sizes = [2, 8, 32], strides = [1, 1, 1]} : vector<2x8x128xf32> to vector<2x8x32xf32>
    %c0_14 = arith.constant 0 : index
    %c0_15 = arith.constant 0 : index
    %c0_16 = arith.constant 0 : index
    %37 = vector.load %arg4[%c0_14, %c0_15, %c0_16] : memref<2x8x32xf32, #tpu.memory_space<vmem>>, vector<2x8x32xf32>
    tpu.vector_store %arg4[%c0_14, %c0_15, %c0_16], %36 {strides = array<i32>} : memref<2x8x32xf32, #tpu.memory_space<vmem>>, vector<2x8x32xf32>,
    return
  }
  func.func @transform_0(%arg0: i32) -> (i32, i32, i32) {
    %c0_i32 = arith.constant 0 : i32
    %c0_i32_0 = arith.constant 0 : i32
    %c0_i32_1 = arith.constant 0 : i32
    return %arg0, %c0_i32, %c0_i32_0 : i32, i32, i32
  }
  func.func @transform_1(%arg0: i32) -> (i32, i32) {
    %c0_i32 = arith.constant 0 : i32
    %c0_i32_0 = arith.constant 0 : i32
    %c0_i32_1 = arith.constant 0 : i32
    return %c0_i32, %c0_i32_0 : i32, i32
  }
  func.func @transform_2(%arg0: i32) -> (i32, i32) {
    %c0_i32 = arith.constant 0 : i32
    %c0_i32_0 = arith.constant 0 : i32
    %c0_i32_1 = arith.constant 0 : i32
    return %c0_i32, %c0_i32_0 : i32, i32
  }
  func.func @transform_3(%arg0: i32) -> (i32, i32, i32) {
    %c0_i32 = arith.constant 0 : i32
    %c0_i32_0 = arith.constant 0 : i32
    %c0_i32_1 = arith.constant 0 : i32
    return %arg0, %c0_i32, %c0_i32_0 : i32, i32, i32
  }
}

</mosaic_0001>

<bundles_post_ra>
// kernel: tpu_custom_call.1
= control target key start
LH: loop header
LB: loop body
LE: loop exit
PB: predicated region body
PF: predicated region fallthrough
CT: control target
= control target key end

     0   :  { %8 = vsyncpa [#allocation3], 0  ;;  %s1730_s0 = inlined_call_operand.hbm [shape: f32[2,8,32], index: 0, kind: input, shape index: {}]   ;;  %s1731_s1 = inlined_call_operand.hbm [shape: f32[32,384], index: 1, kind: input, shape index: {}]   ;;  %s1732_s2 = inlined_call_operand.hbm [shape: f32[1,384], index: 2, kind: input, shape index: {}]   ;;  %s1733_s3 = inlined_call_operand.hbm [shape: f32[2,8,32], index: 3, kind: output, shape index: {}]  }
   0x1   :  { %9 = vsyncpa [#allocation6], 0  ;;  %s28_s14 = sshll.u32 %s1731_s1, 4  ;;  %s29_s14 = int_to_ptr.hbm [resolvable:$true] %s28_s14 }
   0x2   :  { %10 = vsyncpa [#allocation4], 0  ;;  %s1538_s15 = smov [#allocation5]   ;;  %s15_s19 = sshll.u32 %s1730_s0, 4  ;;  %s16_s19 = int_to_ptr.hbm [resolvable:$true] %s15_s19 }
   0x3   :  { %s30_s16 = sshll.u32 %s1538_s15, 4  ;;  %s1539_s20 = smov 384   ;;  %s31_s16 = int_to_ptr.vmem [resolvable:$true] %s30_s16 }
   0x4   :  { %s1540_s21 = smov 24   ;;  %s1541_s22 = smov [#allocation2]  }
   0x5   :  { %36 = dma.hbm_to_vmem [thread:$0]  %s29_s14, 1536, %s31_s16, [#allocation6], %s1539_s20, %s1539_s20, %s1540_s21  }
   0x6   :  { %s17_s23 = sshll.u32 %s1541_s22, 4  ;;  %s1542_s24 = smov 128   ;;  %s18_s23 = int_to_ptr.vmem [resolvable:$true] %s17_s23 }
   0x7   :  { %s1543_s25 = smov 8   ;;  %s42_s27 = sshll.u32 %s1732_s2, 4  ;;  %s43_s27 = int_to_ptr.hbm [resolvable:$true] %s42_s27 }
   0x8   :  { %23 = dma.hbm_to_vmem [thread:$0]  %s16_s19, 256, %s18_s23, [#allocation3], %s1542_s24, %s1542_s24, %s1543_s25  }
   0x9   :  { %s1544_s28 = smov [#allocation7]  }
   0xa   :  { %s44_s0 = sshll.u32 %s1544_s28, 4  ;;  %s45_s0 = int_to_ptr.vmem [resolvable:$true] %s44_s0 }
   0xb   :  { %47 = dma.hbm_to_vmem [thread:$0]  %s43_s27, 48, %s45_s0, [#allocation6]  }
   0xc   :  { %1532 = dma.done.wait [#allocation3], 256  }
   0xd   :  { %1533 = vsyncadd [#allocation3], 4294967040 }
   0xe   :  { %1534 = dma.done.wait [#allocation6], 1584  }
   0xf   :  { %1535 = vsyncadd [#allocation6], 4294965712  ;;  %vm82_vm0 = vcmask 261120   ;;  %v71_v0 = vld [vmem:[#allocation5 + $0x48] sm:$0xff]  ;;  %v68_v1 = vld [vmem:[#allocation5 + $0x30] sm:$0xff]  ;;  %vm1045_vm1 = vcmask 64512  }
  0x10   :  { %v65_v2 = vld [vmem:[#allocation5 + $0x18] sm:$0xff]  ;;  %v1580_v3 = vand.u32 4294901760, %v71_v0  ;;  %v1582_v4 = vand.u32 4294901760, %v68_v1  ;;  %v62_v6 = vld [vmem:[#allocation5] sm:$0xff]  ;;  %v60_v7 = vld [vmem:[#allocation2] sm:$0xff]  ;;  %vm1545_vm8 = vmmov 1  }
  0x11   :  { %v1584_v5 = vand.u32 4294901760, %v65_v2  ;;  %v61_v8 = vld [vmem:[#allocation2 + $0x8] sm:$0xff]  ;;  %v1586_v9 = vand.u32 4294901760, %v62_v6  ;;  %v84_v10 = vsel %vm82_vm0, %v60_v7, 0  ;;  %v72_v12 = vld [vmem:[#allocation5 + $0x50] sm:$0xff]  ;;  %v66_v18 = vld [vmem:[#allocation5 + $0x20] sm:$0xff] }
  0x12   :  { %v87_v11 = vsel %vm82_vm0, %v61_v8, 0  ;;  %v69_v13 = vld [vmem:[#allocation5 + $0x38] sm:$0xff]  ;;  %102 = vmatpush.msra.mxu0 %v1580_v3  ;;  %v139_v14 = vsub.f32 %v71_v0, %v1580_v3  ;;  %v145_v15 = vsub.f32 %v68_v1, %v1582_v4  ;;  %219 = vmatpush.msra.mxu3 %v1580_v3  ;;  %v1595_v17 = vand.u32 4294901760, %v84_v10  ;;  %v63_v38 = vld [vmem:[#allocation5 + $0x8] sm:$0xff]  ;;  %v70_v0 = vld [vmem:[#allocation5 + $0x40] sm:$0xff]  ;;  %s1547_s2 = smov [#allocation8]  }
  0x13   :  { %v151_v16 = vsub.f32 %v65_v2, %v1584_v5  ;;  %v1598_v19 = vsub.f32 %v62_v6, %v1586_v9  ;;  %v1600_v20 = vand.u32 4294901760, %v87_v11  ;;  %v1602_v21 = vand.u32 4294901760, %v72_v12  ;;  %v73_v62 = vld [vmem:[#allocation5 + $0x58] sm:$0xff]  ;;  %v64_v7 = vld [vmem:[#allocation5 + $0x10] sm:$0xff]  ;;  %s1400_s29 = sshll.u32 %s1547_s2, 4  ;;  %s1402_s5 = sshll.u32 %s1733_s3, 4  ;;  %s1401_s29 = int_to_ptr.vmem [resolvable:$true] %s1400_s29  ;;  %s1403_s5 = int_to_ptr.hbm [resolvable:$true] %s1402_s5 }
  0x14   :  { %v1604_v22 = vand.u32 4294901760, %v69_v13  ;;  %104 = vmatpush.msra.mxu0 %v1582_v4  ;;  %185 = vmatpush.msra.mxu2 %v139_v14  ;;  %v140_v23 = vand.u32 4294901760, %v139_v14  ;;  %v1608_v24 = vsub.f32 %v84_v10, %v1595_v17  ;;  %v146_v25 = vand.u32 4294901760, %v145_v15 }
  0x15   :  { %v152_v26 = vand.u32 4294901760, %v151_v16  ;;  %221 = vmatpush.msra.mxu3 %v1582_v4  ;;  %v158_v27 = vand.u32 4294901760, %v1598_v19  ;;  %v1613_v28 = vsub.f32 %v87_v11, %v1600_v20  ;;  %v1616_v29 = vsub.f32 %v72_v12, %v1602_v21 }
  0x16   :  { %v1618_v30 = vand.u32 4294901760, %v66_v18  ;;  %106 = vmatpush.msra.mxu0 %v1584_v5  ;;  %188 = vmatpush.msra.mxu2 %v145_v15  ;;  %v141_v31 = vsub.f32 %v139_v14, %v140_v23  ;;  %v1622_v32 = vand.u32 4294901760, %v1608_v24  ;;  %v147_v33 = vsub.f32 %v145_v15, %v146_v25 }
  0x17   :  { %v153_v34 = vsub.f32 %v151_v16, %v152_v26  ;;  %223 = vmatpush.msra.mxu3 %v1584_v5  ;;  %v159_v35 = vsub.f32 %v1598_v19, %v158_v27  ;;  %v356_v36 = vand.u32 4294901760, %v1616_v29  ;;  %v361_v37 = vsub.f32 %v69_v13, %v1604_v22 }
  0x18   :  { %108 = vmatpush.msra.mxu0 %v1586_v9  ;;  %v142_v39 = vand.u32 4294901760, %v141_v31  ;;  %191 = vmatpush.msra.mxu2 %v151_v16  ;;  %v112_v40 = vsub.f32 %v1608_v24, %v1622_v32  ;;  %v148_v41 = vand.u32 4294901760, %v147_v33  ;;  %v1632_v42 = vand.u32 4294901760, %v1613_v28 }
  0x19   :  { %225 = vmatpush.msra.mxu3 %v1586_v9  ;;  %v357_v43 = vsub.f32 %v1616_v29, %v356_v36  ;;  %v362_v44 = vand.u32 4294901760, %v361_v37  ;;  %v154_v46 = vand.u32 4294901760, %v153_v34  ;;  %v323_v47 = vand.u32 4294901760, %v63_v38 }
  0x1a   :  { %254 = vmatpush.msrb.mxu0 %v140_v23  ;;  %143 = vmatpush.msra.mxu1 %v142_v39  ;;  %v1636_v45 = vand.u32 4294901760, %v112_v40  ;;  %v367_v48 = vsub.f32 %v66_v18, %v1618_v30  ;;  %v160_v51 = vand.u32 4294901760, %v159_v35  ;;  %v120_v52 = vsub.f32 %v1613_v28, %v1632_v42 }
  0x1b   :  { %194 = vmatpush.msra.mxu2 %v1598_v19  ;;  %229 = vmatmul.f32.vlgmr.msra.gmra.mxu3 %v1622_v32  ;;  %v358_v49 = vand.u32 4294901760, %v357_v43  ;;  %v363_v50 = vsub.f32 %v361_v37, %v362_v44  ;;  %v373_v54 = vsub.f32 %v63_v38, %v323_v47  ;;  %v533_v63 = vand.u32 4294901760, %v73_v62 }
  0x1c   :  { %197 = vmatmul.f32.vlgmr.msra.gmra.mxu2 %v1608_v24  ;;  %114 = vmatmul.f32.vlgmr.msra.gmra.mxu0 %v1636_v45  ;;  %v368_v53 = vand.u32 4294901760, %v367_v48  ;;  %v1647_v58 = vand.u32 4294901760, %v120_v52  ;;  %v535_v2 = vand.u32 4294901760, %v70_v0  ;;  %v539_v11 = vand.u32 4294901760, %v64_v7 }
  0x1d   :  { %149 = vmatpush.msra.mxu1 %v148_v41  ;;  %258 = vmatpush.msrb.mxu0 %v146_v25  ;;  %v364_v55 = vand.u32 4294901760, %v363_v50  ;;  %v374_v57 = vand.u32 4294901760, %v373_v54  ;;  %v571_v1 = vsub.f32 %v73_v62, %v533_v63  ;;  %v1693_v25 = vld [vmem:[#allocation7] sm:$0x7] }
  0x1e   :  { %318 = vmatpush.msrb.mxu2 %v1602_v21  ;;  %359 = vmatpush.msrb.mxu3 %v358_v49  ;;  %v369_v56 = vsub.f32 %v367_v48, %v368_v53  ;;  %v589_v15 = vsub.f32 %v64_v7, %v539_v11  ;;  %v77_v43 = vperm.slane %v1693_v25, 1 }
  0x1f   :  { %155 = vmatpush.msra.mxu1 %v154_v46  ;;  %262 = vmatpush.msrb.mxu0 %v152_v26  ;;  %v375_v59 = vsub.f32 %v373_v54, %v374_v57 }
  0x20   :  { %320 = vmatpush.msrb.mxu2 %v1604_v22  ;;  %365 = vmatpush.msrb.mxu3 %v364_v55  ;;  %v370_v60 = vand.u32 4294901760, %v369_v56  ;;  %v590_v19 = vand.u32 4294901760, %v589_v15 }
  0x21   :  { %161 = vmatpush.msra.mxu1 %v160_v51  ;;  %266 = vmatpush.msrb.mxu0 %v158_v27  ;;  %v376_v61 = vand.u32 4294901760, %v375_v59 }
  0x22   :  { %163 = vmatmul.f32.vlgmr.msra.gmra.mxu1 %v1595_v17  ;;  %322 = vmatpush.msrb.mxu2 %v1618_v30 }
  0x23   :  { %289 = vmatpush.msrb.mxu1 %v1580_v3  ;;  %235 = vmatmul.f32.gmra.mxu3 %v1632_v42  ;;  %v67_v3 = vld [vmem:[#allocation5 + $0x28] sm:$0xff] }
  0x24   :  { %202 = vmatmul.f32.gmra.mxu2 %v1613_v28  ;;  %122 = vmatmul.f32.gmra.mxu0 %v1647_v58  ;;  %v537_v6 = vand.u32 4294901760, %v67_v3 }
  0x25   :  { %291 = vmatpush.msrb.mxu1 %v1582_v4  ;;  %324 = vmatpush.msrb.mxu2 %v323_v47  ;;  %v572_v4 = vand.u32 4294901760, %v571_v1 }
  0x26   :  { %371 = vmatpush.msrb.mxu3 %v370_v60  ;;  %401 = vmatpush.msra.mxu0 %v1616_v29  ;;  %v583_v10 = vsub.f32 %v67_v3, %v537_v6 }
  0x27   :  { %293 = vmatpush.msrb.mxu1 %v1584_v5  ;;  %470 = vmatpush.msra.mxu2 %v356_v36  ;;  %v577_v5 = vsub.f32 %v70_v0, %v535_v2  ;;  %v573_v8 = vsub.f32 %v571_v1, %v572_v4 }
  0x28   :  { %377 = vmatpush.msrb.mxu3 %v376_v61  ;;  %404 = vmatpush.msra.mxu0 %v361_v37  ;;  %v584_v14 = vand.u32 4294901760, %v583_v10 }
  0x29   :  { %295 = vmatpush.msrb.mxu1 %v1586_v9  ;;  %474 = vmatpush.msra.mxu2 %v362_v44  ;;  %v578_v9 = vand.u32 4294901760, %v577_v5  ;;  %v574_v12 = vand.u32 4294901760, %v573_v8 }
  0x2a   :  { %167 = vmatmul.f32.gmra.mxu1 %v1600_v20  ;;  %407 = vmatpush.msra.mxu0 %v367_v48  ;;  %v585_v18 = vsub.f32 %v583_v10, %v584_v14 }
  0x2b   :  { %505 = vmatpush.msra.mxu3 %v1602_v21  ;;  %435 = vmatpush.msra.mxu1 %v1602_v21  ;;  %v579_v13 = vsub.f32 %v577_v5, %v578_v9 }
  0x2c   :  { %330 = vmatmul.f32.vlgmr.msrb.gmra.mxu2 %v1636_v45  ;;  %379 = vmatmul.f32.vlgmr.msrb.gmra.mxu3 %v1595_v17  ;;  %v586_v21 = vand.u32 4294901760, %v585_v18 }
  0x2d   :  { %268 = vmatmul.f32.vlgmr.msrb.gmra.mxu0 %v1595_v17  ;;  %478 = vmatpush.msra.mxu2 %v368_v53  ;;  %v580_v16 = vand.u32 4294901760, %v579_v13 }
  0x2e   :  { %410 = vmatpush.msra.mxu0 %v373_v54  ;;  %507 = vmatpush.msra.mxu3 %v1604_v22 }
  0x2f   :  { %437 = vmatpush.msra.mxu1 %v1604_v22  ;;  %482 = vmatpush.msra.mxu2 %v374_v57  ;;  %v591_v22 = vsub.f32 %v589_v15, %v590_v19 }
  0x30   :  { %509 = vmatpush.msra.mxu3 %v1618_v30  ;;  %534 = vmatpush.msrb.mxu0 %v533_v63 }
  0x31   :  { %439 = vmatpush.msra.mxu1 %v1618_v30  ;;  %617 = vmatpush.msrb.mxu2 %v571_v1  ;;  %v592_v23 = vand.u32 4294901760, %v591_v22  ;;  %v76_v30 = vperm.slane %v1693_v25, 0 }
  0x32   :  { %297 = vmatmul.f32.vlgmr.msrb.gmra.mxu1 %v1595_v17  ;;  %511 = vmatpush.msra.mxu3 %v323_v47 }
  0x33   :  { %441 = vmatpush.msra.mxu1 %v323_v47  ;;  %536 = vmatpush.msrb.mxu0 %v535_v2 }
  0x34   :  { %338 = vmatmul.f32.gmra.mxu2 %v1647_v58  ;;  %383 = vmatmul.f32.gmra.mxu3 %v1600_v20 }
  0x35   :  { %272 = vmatmul.f32.gmra.mxu0 %v1600_v20  ;;  %651 = vmatpush.msrb.mxu3 %v533_v63 }
  0x36   :  { %538 = vmatpush.msrb.mxu0 %v537_v6  ;;  %620 = vmatpush.msrb.mxu2 %v577_v5 }
  0x37   :  { %653 = vmatpush.msrb.mxu3 %v535_v2  ;;  %575 = vmatpush.msrb.mxu1 %v574_v12 }
  0x38   :  { %540 = vmatpush.msrb.mxu0 %v539_v11  ;;  %623 = vmatpush.msrb.mxu2 %v583_v10 }
  0x39   :  { %655 = vmatpush.msrb.mxu3 %v537_v6  ;;  %581 = vmatpush.msrb.mxu1 %v580_v16 }
  0x3a   :  { %301 = vmatmul.f32.gmra.mxu1 %v1600_v20  ;;  %626 = vmatpush.msrb.mxu2 %v589_v15 }
  0x3b   :  { %657 = vmatpush.msrb.mxu3 %v539_v11  ;;  %587 = vmatpush.msrb.mxu1 %v586_v21 }
  0x3c   :  { %484 = vmatmul.f32.vlgmr.msra.gmra.mxu2 %v1595_v17  ;;  %513 = vmatmul.f32.vlgmr.msra.gmra.mxu3 %v1595_v17 }
  0x3d   :  { %413 = vmatmul.f32.vlgmr.msra.gmra.mxu0 %v1608_v24  ;;  %593 = vmatpush.msrb.mxu1 %v592_v23 }
  0x3e   :  { %686 = vmatpush.msra.mxu0 %v572_v4 }
  0x40   :  { %690 = vmatpush.msra.mxu0 %v578_v9 }
  0x42   :  { %445 = vmatmul.f32.vlgmr.msra.gmra.mxu1 %v1622_v32  ;;  %694 = vmatpush.msra.mxu0 %v584_v14 }
  0x43   :  { %721 = vmatpush.msra.mxu1 %v533_v63 }
  0x44   :  { %488 = vmatmul.f32.gmra.mxu2 %v1600_v20  ;;  %517 = vmatmul.f32.gmra.mxu3 %v1600_v20 }
  0x45   :  { %418 = vmatmul.f32.gmra.mxu0 %v1613_v28  ;;  %723 = vmatpush.msra.mxu1 %v535_v2 }
  0x46   :  { %698 = vmatpush.msra.mxu0 %v590_v19 }
  0x47   :  { %725 = vmatpush.msra.mxu1 %v537_v6 }
  0x49   :  { %727 = vmatpush.msra.mxu1 %v539_v11 }
  0x4a   :  { %451 = vmatmul.f32.gmra.mxu1 %v1632_v42 }
  0x4c   :  { %661 = vmatmul.f32.vlgmr.msrb.gmra.mxu3 %v1622_v32  ;;  %629 = vmatmul.f32.vlgmr.msrb.gmra.mxu2 %v1608_v24 }
  0x4d   :  { %546 = vmatmul.f32.vlgmr.msrb.gmra.mxu0 %v1636_v45 }
  0x52   :  { %595 = vmatmul.f32.vlgmr.msrb.gmra.mxu1 %v1595_v17 }
  0x54   :  { %667 = vmatmul.f32.gmra.mxu3 %v1632_v42  ;;  %634 = vmatmul.f32.gmra.mxu2 %v1613_v28 }
  0x55   :  { %554 = vmatmul.f32.gmra.mxu0 %v1647_v58 }
  0x5a   :  { %599 = vmatmul.f32.gmra.mxu1 %v1600_v20 }
  0x5d   :  { %700 = vmatmul.f32.vlgmr.msra.gmra.mxu0 %v1595_v17 }
  0x62   :  { %729 = vmatmul.f32.vlgmr.msra.gmra.mxu1 %v1595_v17 }
  0x65   :  { %704 = vmatmul.f32.gmra.mxu0 %v1600_v20 }
  0x6a   :  { %733 = vmatmul.f32.gmra.mxu1 %v1600_v20 }
  0x99   :  { %v115_v24 = vpop.f32.mrf.mxu0 }
  0x9a   :  { %v116_v28 = vadd.f32 %v115_v24, %v76_v30 }
  0x9e   :  { %v230_v29 = vpop.f32.mrf.mxu3 }
  0x9f   :  { %v164_v26 = vpop.f32.mrf.mxu1  ;;  %v198_v27 = vpop.f32.mrf.mxu2 }
  0xa0   :  { %v165_v35 = vadd.f32 %v164_v26, %v116_v28 }
  0xa1   :  { %v123_v31 = vpop.f32.mrf.mxu0 }
  0xa2   :  { %v199_v37 = vadd.f32 %v198_v27, %v165_v35  ;;  %v124_v44 = vadd.f32 %v123_v31, %v76_v30 }
  0xa4   :  { %v231_v40 = vadd.f32 %v230_v29, %v199_v37 }
  0xa6   :  { %v236_v34 = vpop.f32.mrf.mxu3 }
  0xa7   :  { %v168_v32 = vpop.f32.mrf.mxu1  ;;  %v203_v33 = vpop.f32.mrf.mxu2 }
  0xa8   :  { %v169_v49 = vadd.f32 %v168_v32, %v124_v44 }
  0xaa   :  { %v269_v36 = vpop.f32.mrf.mxu0  ;;  %v204_v53 = vadd.f32 %v203_v33, %v169_v49  ;;  %v78_v33 = vperm.slane %v1693_v25, 2 }
  0xab   :  { %v270_v42 = vadd.f32 %v269_v36, %v231_v40 }
  0xac   :  { %v237_v61 = vadd.f32 %v236_v34, %v204_v53 }
  0xaf   :  { %v298_v17 = vpop.f32.mrf.mxu1  ;;  %v331_v38 = vpop.f32.mrf.mxu2 }
  0xb0   :  { %v380_v39 = vpop.f32.mrf.mxu3  ;;  %v299_v45 = vadd.f32 %v298_v17, %v270_v42  ;;  %v332_v20 = vadd.f32 %v331_v38, %v77_v43 }
  0xb2   :  { %v273_v41 = vpop.f32.mrf.mxu0  ;;  %v754_v50 = vand.u32 4294901760, %v299_v45  ;;  %v381_v52 = vadd.f32 %v380_v39, %v332_v20 }
  0xb3   :  { %v274_v0 = vadd.f32 %v273_v41, %v237_v61 }
  0xb4   :  { %v755_v54 = vsub.f32 %v299_v45, %v754_v50 }
  0xb6   :  { %v756_v62 = vand.u32 4294901760, %v755_v54 }
  0xb7   :  { %v302_v46 = vpop.f32.mrf.mxu1  ;;  %v339_v47 = vpop.f32.mrf.mxu2 }
  0xb8   :  { %v384_v48 = vpop.f32.mrf.mxu3  ;;  %v340_v58 = vadd.f32 %v339_v47, %v77_v43  ;;  %v757_v4 = vsub.f32 %v755_v54, %v756_v62  ;;  %v303_v5 = vadd.f32 %v302_v46, %v274_v0 }
  0xba   :  { %v414_v51 = vpop.f32.mrf.mxu0  ;;  %v385_v2 = vadd.f32 %v384_v48, %v340_v58  ;;  %v900_v12 = vand.u32 4294901760, %v303_v5  ;;  %v758_v14 = vand.u32 4294901760, %v757_v4 }
  0xbb   :  { %v415_v55 = vadd.f32 %v414_v51, %v381_v52 }
  0xbc   :  { %v901_v21 = vsub.f32 %v303_v5, %v900_v12 }
  0xbe   :  { %v902_v26 = vand.u32 4294901760, %v901_v21 }
  0xbf   :  { %v446_v56 = vpop.f32.mrf.mxu1  ;;  %v485_v57 = vpop.f32.mrf.mxu2 }
  0xc0   :  { %v447_v59 = vadd.f32 %v446_v56, %v415_v55  ;;  %v514_v60 = vpop.f32.mrf.mxu3  ;;  %v903_v30 = vsub.f32 %v901_v21, %v902_v26 }
  0xc2   :  { %v486_v63 = vadd.f32 %v485_v57, %v447_v59  ;;  %v419_v1 = vpop.f32.mrf.mxu0  ;;  %v904_v28 = vand.u32 4294901760, %v903_v30 }
  0xc3   :  { %v420_v6 = vadd.f32 %v419_v1, %v385_v2 }
  0xc4   :  { %v515_v3 = vadd.f32 %v514_v60, %v486_v63 }
  0xc6   :  { %v752_v7 = vand.u32 4294901760, %v515_v3 }
  0xc7   :  { %v452_v8 = vpop.f32.mrf.mxu1  ;;  %v489_v9 = vpop.f32.mrf.mxu2 }
  0xc8   :  { %v779_v10 = vsub.f32 %v515_v3, %v752_v7  ;;  %v453_v11 = vadd.f32 %v452_v8, %v420_v6  ;;  %753 = vmatpush.xpose.msra.mxu2 %v752_v7  ;;  %877 = vmatpush.xpose.msrb.mxu1 %v752_v7  ;;  %v518_v13 = vpop.f32.mrf.mxu3 }
  0xca   :  { %v780_v15 = vand.u32 4294901760, %v779_v10  ;;  %v490_v16 = vadd.f32 %v489_v9, %v453_v11  ;;  %v547_v32 = vpop.f32.mrf.mxu0 }
  0xcb   :  { %759 = vmatmul.f32.vlgmr.msra.gmra.mxu2 %v758_v14  ;;  %879 = vmatmul.f32.vlgmr.msrb.gmra.mxu1 %v754_v50  ;;  %v548_v34 = vadd.f32 %v547_v32, %v78_v33 }
  0xcc   :  { %806 = vmatpush.xpose.msrb.mxu2 %v779_v10  ;;  %v781_v18 = vsub.f32 %v779_v10, %v780_v15  ;;  %v519_v19 = vadd.f32 %v518_v13, %v490_v16  ;;  %855 = vmatpush.xpose.msrb.mxu0 %v780_v15 }
  0xce   :  { %v898_v22 = vand.u32 4294901760, %v519_v19  ;;  %v782_v23 = vand.u32 4294901760, %v781_v18 }
  0xcf   :  { %857 = vmatmul.f32.vlgmr.msrb.gmra.mxu0 %v754_v50  ;;  %v596_v35 = vpop.f32.mrf.mxu1  ;;  %v630_v17 = vpop.f32.mrf.mxu2 }
  0xd0   :  { %v925_v24 = vsub.f32 %v519_v19, %v898_v22  ;;  %783 = vmatpush.xpose.msra.mxu3 %v782_v23  ;;  %899 = vmatpush.xpose.msra.mxu2 %v898_v22  ;;  %v597_v36 = vadd.f32 %v596_v35, %v548_v34  ;;  %v662_v39 = vpop.f32.mrf.mxu3 }
  0xd1   :  { %975 = vmatpush.xpose.msra.mxu1 %v898_v22 }
  0xd2   :  { %v926_v27 = vand.u32 4294901760, %v925_v24  ;;  %952 = vmatpush.xpose.msra.mxu0 %v925_v24  ;;  %v555_v37 = vpop.f32.mrf.mxu0  ;;  %v631_v38 = vadd.f32 %v630_v17, %v597_v36 }
  0xd3   :  { %785 = vmatmul.f32.vlgmr.msra.gmra.mxu3 %v754_v50  ;;  %809 = vmatmul.f32.vlgmr.msrb.gmra.mxu2 %v755_v54  ;;  %v556_v20 = vadd.f32 %v555_v37, %v78_v33 }
  0xd4   :  { %829 = vmatpush.xpose.msrb.mxu3 %v752_v7  ;;  %v927_v29 = vsub.f32 %v925_v24, %v926_v27  ;;  %979 = vmatmul.f32.vlgmr.msra.gmra.mxu1 %v902_v26  ;;  %v663_v41 = vadd.f32 %v662_v39, %v631_v38 }
  0xd5   :  { %1001 = vmatpush.xpose.msrb.mxu2 %v926_v27 }
  0xd6   :  { %v928_v31 = vand.u32 4294901760, %v927_v29 }
  0xd7   :  { %955 = vmatmul.f32.vlgmr.msra.gmra.mxu0 %v901_v21  ;;  %v600_v40 = vpop.f32.mrf.mxu1  ;;  %v635_v48 = vpop.f32.mrf.mxu2 }
  0xd8   :  { %929 = vmatpush.xpose.msra.mxu3 %v928_v31  ;;  %v601_v25 = vadd.f32 %v600_v40, %v556_v20  ;;  %v668_v51 = vpop.f32.mrf.mxu3 }
  0xda   :  { %v701_v42 = vpop.f32.mrf.mxu0  ;;  %v636_v49 = vadd.f32 %v635_v48, %v601_v25 }
  0xdb   :  { %833 = vmatmul.f32.vlgmr.msrb.gmra.mxu3 %v756_v62  ;;  %905 = vmatmul.f32.vlgmr.msra.gmra.mxu2 %v904_v28  ;;  %v702_v43 = vadd.f32 %v701_v42, %v663_v41 }
  0xdc   :  { %1023 = vmatpush.xpose.msrb.mxu3 %v898_v22  ;;  %v669_v53 = vadd.f32 %v668_v51, %v636_v49 }
  0xdf   :  { %v730_v44 = vpop.f32.mrf.mxu1 }
  0xe0   :  { %v731_v45 = vadd.f32 %v730_v44, %v702_v43 }
  0xe2   :  { %v1114_v46 = vand.u32 4294901760, %v731_v45  ;;  %v705_v54 = vpop.f32.mrf.mxu0 }
  0xe3   :  { %931 = vmatmul.f32.vlgmr.msra.gmra.mxu3 %v900_v12  ;;  %1003 = vmatmul.f32.vlgmr.msrb.gmra.mxu2 %v900_v12  ;;  %v706_v56 = vadd.f32 %v705_v54, %v669_v53  ;;  %v1546_v54 = vmov 0.0  }
  0xe4   :  { %v1141_v47 = vsub.f32 %v731_v45, %v1114_v46  ;;  %1115 = vmatpush.msrb.mxu0 %v1114_v46  ;;  %1191 = vmatpush.msra.mxu3 %v1114_v46 }
  0xe6   :  { %1168 = vmatpush.msra.mxu2 %v1141_v47  ;;  %v1142_v50 = vand.u32 4294901760, %v1141_v47 }
  0xe7   :  { %v734_v57 = vpop.f32.mrf.mxu1 }
  0xe8   :  { %v1143_v52 = vsub.f32 %v1141_v47, %v1142_v50  ;;  %1217 = vmatpush.msra.mxu0 %v1142_v50  ;;  %v735_v58 = vadd.f32 %v734_v57, %v706_v56 }
  0xea   :  { %v1144_v55 = vand.u32 4294901760, %v1143_v52  ;;  %v1699_v59 = vand.u32 4294901760, %v735_v58 }
  0xeb   :  { %1025 = vmatmul.f32.vlgmr.msrb.gmra.mxu3 %v900_v12 }
  0xec   :  { %1145 = vmatpush.msrb.mxu1 %v1144_v55  ;;  %v1702_v60 = vsub.f32 %v735_v58, %v1699_v59  ;;  %1264 = vmatpush.msrb.mxu2 %v1699_v59 }
  0xee   :  { %1239 = vmatpush.msra.mxu1 %v1114_v46  ;;  %v1291_v61 = vand.u32 4294901760, %v1702_v60 }
  0xf0   :  { %v1292_v62 = vsub.f32 %v1702_v60, %v1291_v61 }
  0xf2   :  { %v1293_v63 = vand.u32 4294901760, %v1292_v62 }
  0xf4   :  { %1294 = vmatpush.msrb.mxu3 %v1293_v63 }
 0x148   :  { %v880_v8 = vpop.f32.mrf.mxu1 }
 0x14c   :  { %v858_v5 = vpop.f32.mrf.mxu0 }
 0x14e   :  { %v760_v0 = vpop.f32.mrf.mxu2 }
 0x151   :  { %v980_v19 = vpop.f32.mrf.mxu1 }
 0x154   :  { %v956_v16 = vpop.f32.mrf.mxu0 }
 0x156   :  { %v786_v1 = vpop.f32.mrf.mxu3  ;;  %v810_v2 = vpop.f32.mrf.mxu2 }
 0x157   :  { %v787_v3 = vadd.f32 %v786_v1, %v760_v0 }
 0x159   :  { %v811_v4 = vadd.f32 %v810_v2, %v787_v3 }
 0x15e   :  { %v834_v6 = vpop.f32.mrf.mxu3  ;;  %v906_v10 = vpop.f32.mrf.mxu2 }
 0x15f   :  { %v835_v7 = vadd.f32 %v834_v6, %v811_v4 }
 0x161   :  { %v859_v9 = vadd.f32 %v858_v5, %v835_v7 }
 0x163   :  { %v881_v11 = vadd.f32 %v880_v8, %v859_v9 }
 0x165   :  { %v1029_v12 = vmul.f32 0.17677669, %v881_v11 }
 0x166   :  { %v932_v13 = vpop.f32.mrf.mxu3  ;;  %v1004_v24 = vpop.f32.mrf.mxu2 }
 0x167   :  { %v933_v14 = vadd.f32 %v932_v13, %v906_v10  ;;  %v1031_v15 = vand.u32 2147483647, %v1029_v12 }
 0x169   :  { %v957_v18 = vadd.f32 %v956_v16, %v933_v14  ;;  %vm1033_vm2 = vcmp.eq.f32.partialorder %v1031_v15, inf }
 0x16a   :  { %v1035_v21 = vsel %vm1033_vm2, 0.0, %v1029_v12 }
 0x16b   :  { %v981_v22 = vadd.f32 %v980_v19, %v957_v18  ;;  %v1046_v23 = vsel %vm1045_vm1, %v1035_v21, -inf  ;;  %vm1037_vm5 = vcmp.ne.f32.partialorder %v1035_v21, %v1035_v21 }
 0x16c   :  { %1047 = vmax.xlane.f32.xlu0 %v1046_v23  ;;  %vm1039_vm9 = vmxor %vm1037_vm5, %vm1545_vm8 }
 0x16d   :  { %v1005_v26 = vadd.f32 %v1004_v24, %v981_v22  ;;  %v1416_v55 = vsel %vm1039_vm9, 1.0, %v1546_v54 }
 0x16e   :  { %v1026_v27 = vpop.f32.mrf.mxu3 }
 0x16f   :  { %v1027_v29 = vadd.f32 %v1026_v27, %v1005_v26 }
 0x171   :  { %v1030_v30 = vmul.f32 0.17677669, %v1027_v29 }
 0x173   :  { %v1032_v31 = vand.u32 2147483647, %v1030_v30 }
 0x175   :  { %vm1034_vm3 = vcmp.eq.f32.partialorder %v1032_v31, inf }
 0x176   :  { %v1036_v28 = vsel %vm1034_vm3, 0.0, %v1030_v30 }
 0x177   :  { %v1049_v32 = vsel %vm1045_vm1, %v1036_v28, -inf  ;;  %vm1038_vm12 = vcmp.ne.f32.partialorder %v1036_v28, %v1036_v28 }
 0x178   :  { %1050 = vmax.xlane.f32.xlu0 %v1049_v32  ;;  %vm1040_vm15 = vmxor %vm1038_vm12, %vm1545_vm8 }
 0x179   :  { %v1417_v11 = vsel %vm1040_vm15, 1.0, %v1546_v54 }
 0x1df   :  { %v1048_v33 = vpop.xlane.xlu0 %1047 }
 0x1e0   :  { %v1052_v34 = vsub.f32 %v1035_v21, %v1048_v33 }
 0x1e2   :  { %v1054_v35 = vmul.f32 1.442695, %v1052_v34 }
 0x1e4   :  { %1428 = vpow2.f32 %v1054_v35 }
 0x1ea   :  { %v1429_v36 = vpop.eup %1428 }
 0x1eb   :  { %v1051_v37 = vpop.xlane.xlu0 %1050  ;;  %v1058_v17 = vsel %vm1045_vm1, %v1429_v36, 0.0 }
 0x1ec   :  { %v1053_v38 = vsub.f32 %v1036_v28, %v1051_v37  ;;  %1059 = vadd.xlane.f32.xlu1 %v1058_v17 }
 0x1ee   :  { %v1056_v39 = vmul.f32 1.442695, %v1053_v38 }
 0x1f0   :  { %1430 = vpow2.f32 %v1056_v39 }
 0x1f6   :  { %v1431_v40 = vpop.eup %1430 }
 0x1f7   :  { %v1061_v41 = vsel %vm1045_vm1, %v1431_v40, 0.0 }
 0x1f8   :  { %1062 = vadd.xlane.f32.xlu1 %v1061_v41 }
 0x25f   :  { %v1060_v42 = vpop.xlane.xlu1 %1059 }
 0x260   :  { %1432 = vrcp.f32 %v1060_v42  ;;  %v1075_v46 = vand.u32 2147483648, %v1060_v42  ;;  %v1073_v20 = vand.u32 2147483647, %v1060_v42  ;;  %vm1069_vm6 = vweird.f32 %v1060_v42 }
 0x262   :  { %v1076_v49 = vor.u32 1.1754944e-38, %v1075_v46  ;;  %vm1074_vm10 = vcmp.eq.f32.partialorder %v1073_v20, 8.507059e+37 }
 0x266   :  { %v1433_v43 = vpop.eup %1432 }
 0x267   :  { %v1065_v44 = vmul.f32 %v1433_v43, %v1060_v42  ;;  %vm1070_vm4 = vweird.f32 %v1433_v43 }
 0x268   :  { %vm1071_vm7 = vmor %vm1069_vm6, %vm1070_vm4 }
 0x269   :  { %v1066_v45 = vsub.f32 1.0, %v1065_v44 }
 0x26b   :  { %v1067_v47 = vmul.f32 %v1433_v43, %v1066_v45  ;;  %v1063_v25 = vpop.xlane.xlu1 %1062 }
 0x26c   :  { %1434 = vrcp.f32 %v1063_v25  ;;  %v1090_v63 = vand.u32 2147483648, %v1063_v25  ;;  %v1088_v2 = vand.u32 2147483647, %v1063_v25  ;;  %vm1084_vm13 = vweird.f32 %v1063_v25 }
 0x26d   :  { %v1068_v48 = vadd.f32 %v1433_v43, %v1067_v47 }
 0x26e   :  { %v1091_v5 = vor.u32 1.1754944e-38, %v1090_v63  ;;  %vm1089_vm2 = vcmp.eq.f32.partialorder %v1088_v2, 8.507059e+37 }
 0x26f   :  { %v1072_v50 = vsel %vm1071_vm7, %v1433_v43, %v1068_v48 }
 0x270   :  { %v1077_v51 = vsel %vm1074_vm10, %v1076_v49, %v1072_v50 }
 0x271   :  { %v1078_v52 = vmul.f32 %v1429_v36, %v1077_v51 }
 0x272   :  { %v1435_v53 = vpop.eup %1434 }
 0x273   :  { %v1080_v56 = vmul.f32 %v1435_v53, %v1063_v25  ;;  %v1094_v57 = vmul.f32 %v1416_v55, %v1078_v52  ;;  %vm1085_vm11 = vweird.f32 %v1435_v53 }
 0x274   :  { %vm1086_vm14 = vmor %vm1084_vm13, %vm1085_vm11 }
 0x275   :  { %v1081_v58 = vsub.f32 1.0, %v1080_v56  ;;  %v1097_v62 = vsel %vm1045_vm1, %v1094_v57, 0 }
 0x276   :  { %v1116_v0 = vand.u32 4294901760, %v1097_v62 }
 0x277   :  { %v1082_v1 = vmul.f32 %v1435_v53, %v1081_v58 }
 0x278   :  { %1147 = vmatmul.f32.vlgmr.msrb.gmra.mxu1 %v1116_v0  ;;  %v1117_v3 = vsub.f32 %v1097_v62, %v1116_v0 }
 0x279   :  { %v1083_v4 = vadd.f32 %v1435_v53, %v1082_v1  ;;  %1340 = vmatpush.msrb.mxu1 %v1699_v59 }
 0x27a   :  { %1171 = vmatmul.f32.vlgmr.msra.gmra.mxu2 %v1117_v3  ;;  %v1118_v6 = vand.u32 4294901760, %v1117_v3 }
 0x27b   :  { %v1087_v7 = vsel %vm1086_vm14, %v1435_v53, %v1083_v4  ;;  %1366 = vmatpush.msra.mxu2 %v1291_v61 }
 0x27c   :  { %v1092_v8 = vsel %vm1089_vm2, %v1091_v5, %v1087_v7  ;;  %1195 = vmatmul.f32.vlgmr.msra.gmra.mxu3 %v1118_v6  ;;  %v1119_v9 = vsub.f32 %v1117_v3, %v1118_v6 }
 0x27d   :  { %v1093_v10 = vmul.f32 %v1431_v40, %v1092_v8  ;;  %1388 = vmatpush.msra.mxu3 %v1699_v59 }
 0x27e   :  { %v1120_v12 = vand.u32 4294901760, %v1119_v9 }
 0x27f   :  { %v1095_v13 = vmul.f32 %v1417_v11, %v1093_v10 }
 0x280   :  { %1121 = vmatmul.f32.vlgmr.msrb.gmra.mxu0 %v1120_v12  ;;  %1241 = vmatmul.f32.vlgmr.msra.gmra.mxu1 %v1116_v0 }
 0x281   :  { %1317 = vmatpush.msrb.mxu0 %v1702_v60  ;;  %v1246_v14 = vsel %vm1045_vm1, %v1095_v13, 0 }
 0x282   :  { %v1265_v15 = vand.u32 4294901760, %v1246_v14 }
 0x284   :  { %v1266_v16 = vsub.f32 %v1246_v14, %v1265_v15  ;;  %1296 = vmatmul.f32.vlgmr.msrb.gmra.mxu3 %v1265_v15 }
 0x286   :  { %v1267_v18 = vand.u32 4294901760, %v1266_v16 }
 0x288   :  { %1219 = vmatmul.f32.vlgmr.msra.gmra.mxu0 %v1116_v0  ;;  %1344 = vmatmul.f32.vlgmr.msrb.gmra.mxu1 %v1267_v18  ;;  %v1268_v61 = vsub.f32 %v1266_v16, %v1267_v18 }
 0x28a   :  { %v1269_v19 = vand.u32 4294901760, %v1268_v61 }
 0x28c   :  { %1270 = vmatmul.f32.vlgmr.msrb.gmra.mxu2 %v1269_v19  ;;  %1390 = vmatmul.f32.vlgmr.msra.gmra.mxu3 %v1265_v15 }
 0x290   :  { %1320 = vmatmul.f32.vlgmr.msrb.gmra.mxu0 %v1266_v16 }
 0x294   :  { %1368 = vmatmul.f32.vlgmr.msra.gmra.mxu2 %v1265_v15 }
 0x2f5   :  { %v1148_v59 = vpop.f32.mrf.mxu1 }
 0x2fd   :  { %v1122_v21 = vpop.f32.mrf.mxu0  ;;  %v1172_v23 = vpop.f32.mrf.mxu2 }
 0x2fe   :  { %v1149_v22 = vadd.f32 %v1148_v59, %v1122_v21  ;;  %v1242_v30 = vpop.f32.mrf.mxu1 }
 0x2ff   :  { %v1196_v60 = vpop.f32.mrf.mxu3 }
 0x300   :  { %v1173_v24 = vadd.f32 %v1172_v23, %v1149_v22 }
 0x302   :  { %v1197_v26 = vadd.f32 %v1196_v60, %v1173_v24 }
 0x305   :  { %v1220_v27 = vpop.f32.mrf.mxu0 }
 0x306   :  { %v1221_v29 = vadd.f32 %v1220_v27, %v1197_v26  ;;  %v1345_v36 = vpop.f32.mrf.mxu1 }
 0x307   :  { %v1297_v28 = vpop.f32.mrf.mxu3 }
 0x308   :  { %v1243_v31 = vadd.f32 %v1242_v30, %v1221_v29 }
 0x30a   :  { %1394 = vst.msk [vmem:[#allocation8] sm:$0xff] %vm82_vm0, %v1243_v31 }
 0x30d   :  { %v1321_v34 = vpop.f32.mrf.mxu0 }
 0x30f   :  { %v1271_v32 = vpop.f32.mrf.mxu2  ;;  %v1391_v39 = vpop.f32.mrf.mxu3 }
 0x310   :  { %v1298_v33 = vadd.f32 %v1297_v28, %v1271_v32 }
 0x312   :  { %v1322_v35 = vadd.f32 %v1321_v34, %v1298_v33 }
 0x314   :  { %v1346_v37 = vadd.f32 %v1345_v36, %v1322_v35 }
 0x317   :  { %v1369_v17 = vpop.f32.mrf.mxu2 }
 0x318   :  { %v1370_v38 = vadd.f32 %v1369_v17, %v1346_v37 }
 0x31a   :  { %v1392_v40 = vadd.f32 %v1391_v39, %v1370_v38 }
 0x31c   :  { %1395 = vst.msk [vmem:[#allocation8 + $0x8] sm:$0xff] %vm82_vm0, %v1392_v40 }
 0x31d   :  { %1408 = dma.vmem_to_hbm [thread:$0]  %s1401_s29, 256, %s1403_s5, [#allocation4], %s1542_s24, %s1542_s24, %s1543_s25  }
 0x31e   :  { %1536 = dma.done.wait [#allocation4], 256  }
 0x31f   :  { %1537 = vsyncadd [#allocation4], 4294967040 }
 0x320   :  { %1413 = vsyncpa [#allocation3], 1 }
 0x321   :  { %1414 = vsyncpa [#allocation6], 1 }
 0x322   :  { %1415 = vsyncpa [#allocation4], 1 }

</bundles_post_ra>
